<compile_context>
chip_gen: v7x
topology: tpu7x:2x2x1
jax: 0.10.0
libtpu: 0.0.40
codegen_flags: <defaults>
</compile_context>

<pallas_src>
import jax
import jax.numpy as jnp
from jax.experimental import pallas as pl
from jax.experimental.pallas import tpu as pltpu


_PAD_SENTINEL = 1.0e30  # (2*sentinel)^2 overflows f32 -> +inf -> hinge == 0 exactly.


def _round_up(x: int, m: int) -> int:
    return ((x + m - 1) // m) * m


def _dist_hinge_kernel(thresh_ref, self_ref, counts_ref, a_ref, bt_ref,
                       out_ref, acc_ref):
    """One (row-tile, col-tile) step of the hinge-loss reduction for cloud b.

    thresh_ref : (1, 1)        f32 SMEM  -- distance threshold (runtime scalar)
    self_ref   : (1, 1)        i32 SMEM  -- 1 if self-distance mode, else 0
    counts_ref : (B,)          i32 SMEM  -- number of real rows per cloud
    a_ref      : (1, TN, D)    f32 VMEM  -- row tile of pos_a
    bt_ref     : (1, D, TM)    f32 VMEM  -- column tile of pos_b^T (points on lanes)
    out_ref    : (1, 1, 1)     f32 VMEM  -- per-cloud loss (written once, at the end)
    acc_ref    : (1, 1)        f32 VMEM scratch -- running partial sum
    """
    b = pl.program_id(0)
    i = pl.program_id(1)
    j = pl.program_id(2)

    @pl.when(jnp.logical_and(i == 0, j == 0))
    def _():
        acc_ref[...] = jnp.zeros_like(acc_ref)

    t = thresh_ref[0, 0]

    a = a_ref[0]                 # (TN, D)
    bt = bt_ref[0]               # (D, TM)
    d_dim = a.shape[1]

    # Squared distances via the direct difference formula: pure VPU work on the
    # (TN, TM) tile, statically unrolled over the tiny coordinate dimension.
    # (sqrt rides the EUP slot and the reduces ride the XLU slot -- free filler
    # under the VALU bound, so no attempt to "optimize" them.)
    diff = a[:, 0:1] - bt[0:1, :]            # (TN, 1) - (1, TM) -> (TN, TM)
    sq = diff * diff
    for k in range(1, d_dim):
        diff = a[:, k:k + 1] - bt[k:k + 1, :]
        sq = sq + diff * diff

    dist = jnp.sqrt(sq)                      # EUP
    hinge = jnp.maximum(t - dist, 0.0)       # padded rows/cols give exactly 0

    col = jnp.sum(hinge, axis=1, keepdims=True)   # (TN, 1)  lane reduce
    s = jnp.sum(col, axis=0, keepdims=True)       # (1, 1)   sublane reduce
    acc_ref[...] += s

    is_last = jnp.logical_and(i == pl.num_programs(1) - 1,
                              j == pl.num_programs(2) - 1)

    @pl.when(is_last)
    def _():
        tot = acc_ref[...]                                    # (1, 1)
        n_b = counts_ref[b].astype(jnp.float32)
        # sum(triu(h,1)) == (sum(h) - sum(diag(h))) / 2 ; each diagonal hinge is
        # exactly max(t, 0) because d(i, i) == 0 bit-exactly here.
        corrected = 0.5 * (tot - n_b * jnp.maximum(t, 0.0))
        result = jnp.where(self_ref[0, 0] == 1, corrected, tot)
        out_ref[...] = result.reshape(1, 1, 1)


def _dist_hinge_call(a_p, bt_p, counts, thresh, self_flag, *, row_tile, m_tile):
    """Run the batched hinge-loss kernel on pre-padded operands."""
    b_sz, n_pad, d = a_p.shape
    _, _, m_pad = bt_p.shape
    grid = (b_sz, n_pad // row_tile, m_pad // m_tile)

    out = pl.pallas_call(
        _dist_hinge_kernel,
        out_shape=jax.ShapeDtypeStruct((b_sz, 1, 1), jnp.float32),
        grid=grid,
        in_specs=[
            pl.BlockSpec(memory_space=pltpu.MemorySpace.SMEM),       # threshold
            pl.BlockSpec(memory_space=pltpu.MemorySpace.SMEM),       # self-mode flag
            pl.BlockSpec(memory_space=pltpu.MemorySpace.SMEM),       # per-cloud row counts
            pl.BlockSpec((1, row_tile, d), lambda b, i, j: (b, i, 0)),   # row tile of a
            pl.BlockSpec((1, d, m_tile), lambda b, i, j: (b, 0, j)),     # col tile of b^T
        ],
        out_specs=pl.BlockSpec((1, 1, 1), lambda b, i, j: (b, 0, 0)),    # per-cloud loss
        scratch_shapes=[pltpu.VMEM((1, 1), jnp.float32)],                # accumulator
        compiler_params=pltpu.CompilerParams(
            dimension_semantics=("parallel", "arbitrary", "arbitrary"),
            vmem_limit_bytes=32 * 1024 * 1024),
    )(thresh, self_flag, counts, a_p, bt_p)

    return out[:, 0, 0]          # (B,)


def distance_hinge_loss_batched(pos_a, pos_b=None, *, distance_threshold,
                                m_tile=2048):
    """Batched DistanceHingeLoss: pos_a (B,N,D), pos_b (B,M,D) or None.

    Returns a (B,) vector of per-cloud losses.  One pallas_call serves all
    clouds (batch grid axis), amortizing launch/dispatch and the wrapper-side
    pad/transpose HLOs across the batch.
    """
    self_mode = pos_b is None
    if self_mode:
        pos_b = pos_a

    pos_a = jnp.asarray(pos_a, jnp.float32)
    pos_b = jnp.asarray(pos_b, jnp.float32)
    b_sz, n, d = pos_a.shape
    b2, m, d2 = pos_b.shape
    assert b_sz == b2 and d == d2, "batch / coordinate dims must match"

    # Row tile: multiple of 8 sublanes, capped at 128.  Column tile: multiple
    # of 128 lanes, capped at m_tile (keeps (TN, TM) f32 intermediates small on
    # every chip generation; v5e scoped VMEM is only 16 MiB by default).
    tn = min(128, _round_up(n, 8))
    n_pad = _round_up(n, tn)
    m_tile = max(128, _round_up(m_tile, 128))
    tm = min(m_tile, _round_up(m, 128))
    m_pad = _round_up(m, tm)

    # Opposite-signed sentinels => any pad-involving pair has d = +inf -> hinge = 0.
    a_p = jnp.pad(pos_a, ((0, 0), (0, n_pad - n), (0, 0)),
                  constant_values=_PAD_SENTINEL)                       # (B, N_pad, D)
    bt_p = jnp.pad(jnp.transpose(pos_b, (0, 2, 1)),
                   ((0, 0), (0, 0), (0, m_pad - m)),
                   constant_values=-_PAD_SENTINEL)                     # (B, D, M_pad)

    thresh = jnp.asarray(distance_threshold, jnp.float32).reshape(1, 1)
    self_flag = jnp.full((1, 1), 1 if self_mode else 0, jnp.int32)
    counts = jnp.full((b_sz,), n, jnp.int32)

    return _dist_hinge_call(a_p, bt_p, counts, thresh, self_flag,
                            row_tile=tn, m_tile=tm)


def distance_hinge_loss(pos_a, pos_b=None, *, distance_threshold, m_tile=2048):
    """Single-cloud DistanceHingeLoss.forward (thin B=1 wrapper)."""
    self_mode = pos_b is None
    pos_a = jnp.asarray(pos_a, jnp.float32)[None]                      # (1, N, D)
    pos_b_b = None if self_mode else jnp.asarray(pos_b, jnp.float32)[None]
    losses = distance_hinge_loss_batched(pos_a, pos_b_b,
                                         distance_threshold=distance_threshold,
                                         m_tile=m_tile)
    return losses[0]


def _reference(pos_a, pos_b, threshold, self_mode):
    """Pure-JAX reference mirroring torch.cdist + hinge + (optional) triu sum."""
    diff = pos_a[:, None, :] - pos_b[None, :, :]
    dist = jnp.sqrt(jnp.maximum(jnp.sum(diff * diff, axis=-1), 0.0))
    hinge = jnp.maximum(threshold - dist, 0.0)
    if self_mode:
        nn, mm = hinge.shape
        rows = jax.lax.broadcasted_iota(jnp.int32, (nn, mm), 0)
        cols = jax.lax.broadcasted_iota(jnp.int32, (nn, mm), 1)
        hinge = jnp.where(cols > rows, hinge, 0.0)
    return jnp.sum(hinge)


if __name__ == "__main__":
    key = jax.random.PRNGKey(0)
    ka, kb, kc, kd, ke, kf = jax.random.split(key, 6)
    threshold = 2.0

    # Case 1: small single clouds (typical pharmacophore 3-D coordinates).
    pos_a = jax.random.uniform(ka, (16, 3), dtype=jnp.float32) * 4.0
    pos_b = jax.random.uniform(kb, (24, 3), dtype=jnp.float32) * 4.0

    loss_self = distance_hinge_loss(pos_a, None, distance_threshold=threshold)
    loss_cross = distance_hinge_loss(pos_a, pos_b, distance_threshold=threshold)
    jax.block_until_ready((loss_self, loss_cross))

    ref_self = _reference(pos_a, pos_a, threshold, self_mode=True)
    ref_cross = _reference(pos_a, pos_b, threshold, self_mode=False)
    assert jnp.allclose(loss_self, ref_self, rtol=1e-4, atol=1e-4), (loss_self, ref_self)
    assert jnp.allclose(loss_cross, ref_cross, rtol=1e-4, atol=1e-4), (loss_cross, ref_cross)

    # Case 2: larger clouds exercising the row-tile grid, the M-chunk grid axis
    # (m_tile=128 -> multiple column tiles) and the sentinel padding path.
    pos_c = jax.random.uniform(kc, (200, 3), dtype=jnp.float32) * 10.0
    pos_d = jax.random.uniform(kd, (150, 3), dtype=jnp.float32) * 10.0

    loss_self2 = distance_hinge_loss(pos_c, None, distance_threshold=threshold,
                                     m_tile=128)
    loss_cross2 = distance_hinge_loss(pos_c, pos_d, distance_threshold=threshold,
                                      m_tile=128)
    jax.block_until_ready((loss_self2, loss_cross2))

    ref_self2 = _reference(pos_c, pos_c, threshold, self_mode=True)
    ref_cross2 = _reference(pos_c, pos_d, threshold, self_mode=False)
    assert jnp.allclose(loss_self2, ref_self2, rtol=1e-4, atol=1e-4), (loss_self2, ref_self2)
    assert jnp.allclose(loss_cross2, ref_cross2, rtol=1e-4, atol=1e-4), (loss_cross2, ref_cross2)

    # Case 3: batched clouds sharing one pallas_call (both modes).
    batch_a = jax.random.uniform(ke, (3, 16, 3), dtype=jnp.float32) * 4.0
    batch_b = jax.random.uniform(kf, (3, 24, 3), dtype=jnp.float32) * 4.0

    b_self = distance_hinge_loss_batched(batch_a, None,
                                         distance_threshold=threshold)
    b_cross = distance_hinge_loss_batched(batch_a, batch_b,
                                          distance_threshold=threshold)
    jax.block_until_ready((b_self, b_cross))

    for idx in range(3):
        r_s = _reference(batch_a[idx], batch_a[idx], threshold, self_mode=True)
        r_c = _reference(batch_a[idx], batch_b[idx], threshold, self_mode=False)
        assert jnp.allclose(b_self[idx], r_s, rtol=1e-4, atol=1e-4), (idx, b_self[idx], r_s)
        assert jnp.allclose(b_cross[idx], r_c, rtol=1e-4, atol=1e-4), (idx, b_cross[idx], r_c)

    print("KERNEL_OK")
</pallas_src>

<mosaic_0001>
module attributes {stable_mosaic.version = 11 : i64} {
  func.func @_dist_hinge_kernel(%arg0: i32, %arg1: i32, %arg2: i32, %arg3: memref<1x1xf32, #tpu.memory_space<smem>>, %arg4: memref<1x1xi32, #tpu.memory_space<smem>>, %arg5: memref<1xi32, #tpu.memory_space<smem>>, %arg6: memref<1x16x3xf32, #tpu.memory_space<vmem>>, %arg7: memref<1x3x128xf32, #tpu.memory_space<vmem>>, %arg8: memref<1x1x1xf32, #tpu.memory_space<vmem>>, %arg9: memref<1x1xf32, #tpu.memory_space<vmem>>) attributes {dimension_semantics = [#tpu.dimension_semantics<parallel>, #tpu.dimension_semantics<arbitrary>, #tpu.dimension_semantics<arbitrary>], iteration_bounds = array<i64: 1, 1, 1>, scalar_prefetch = 0 : i64, scratch_operands = 1 : i64, tpu.core_type = #tpu.core_type<tc>, window_params = [{transform_indices = @transform_0, window_bounds = array<i64: 1, 1>}, {transform_indices = @transform_1, window_bounds = array<i64: 1, 1>}, {transform_indices = @transform_2, window_bounds = array<i64: 1>}, {transform_indices = @transform_3, window_bounds = array<i64: 1, 16, 3>}, {transform_indices = @transform_4, window_bounds = array<i64: 1, 3, 128>}, {transform_indices = @transform_5, window_bounds = array<i64: 1, 1, 1>}]} {
    %c0_i32 = arith.constant 0 : i32
    %0 = arith.cmpi eq, %arg1, %c0_i32 : i32
    %c0_i32_0 = arith.constant 0 : i32
    %1 = arith.cmpi eq, %arg2, %c0_i32_0 : i32
    %2 = arith.andi %0, %1 : i1
    %3 = arith.extui %2 : i1 to i32
    %c0_i32_1 = arith.constant 0 : i32
    %4 = arith.cmpi ne, %3, %c0_i32_1 : i32
    scf.if %4 {
      %cst_18 = arith.constant 0.000000e+00 : f32
      %47 = vector.broadcast %cst_18 : f32 to vector<1x1xf32>
      %c0_19 = arith.constant 0 : index
      %c0_20 = arith.constant 0 : index
      %48 = vector.load %arg9[%c0_19, %c0_20] : memref<1x1xf32, #tpu.memory_space<vmem>>, vector<1x1xf32>
      tpu.vector_store %arg9[%c0_19, %c0_20], %47 {strides = array<i32>} : memref<1x1xf32, #tpu.memory_space<vmem>>, vector<1x1xf32>,
    } else {
    }
    %c0 = arith.constant 0 : index
    %c0_2 = arith.constant 0 : index
    %5 = memref.load %arg3[%c0, %c0_2] : memref<1x1xf32, #tpu.memory_space<smem>>
    %c0_3 = arith.constant 0 : index
    %c0_4 = arith.constant 0 : index
    %c0_5 = arith.constant 0 : index
    %6 = vector.load %arg6[%c0_3, %c0_4, %c0_5] : memref<1x16x3xf32, #tpu.memory_space<vmem>>, vector<1x16x3xf32>
    %7 = vector.shape_cast %6 : vector<1x16x3xf32> to vector<16x3xf32>
    %c0_6 = arith.constant 0 : index
    %c0_7 = arith.constant 0 : index
    %c0_8 = arith.constant 0 : index
    %8 = vector.load %arg7[%c0_6, %c0_7, %c0_8] : memref<1x3x128xf32, #tpu.memory_space<vmem>>, vector<1x3x128xf32>
    %9 = vector.shape_cast %8 : vector<1x3x128xf32> to vector<3x128xf32>
    %10 = vector.extract_strided_slice %7 {offsets = [0, 0], sizes = [16, 1], strides = [1, 1]} : vector<16x3xf32> to vector<16x1xf32>
    %11 = vector.extract_strided_slice %9 {offsets = [0, 0], sizes = [1, 128], strides = [1, 1]} : vector<3x128xf32> to vector<1x128xf32>
    %12 = vector.broadcast %10 : vector<16x1xf32> to vector<16x128xf32>
    %13 = vector.broadcast %11 : vector<1x128xf32> to vector<16x128xf32>
    %14 = arith.subf %12, %13 : vector<16x128xf32>
    %15 = arith.mulf %14, %14 : vector<16x128xf32>
    %16 = vector.extract_strided_slice %7 {offsets = [0, 1], sizes = [16, 1], strides = [1, 1]} : vector<16x3xf32> to vector<16x1xf32>
    %17 = vector.extract_strided_slice %9 {offsets = [1, 0], sizes = [1, 128], strides = [1, 1]} : vector<3x128xf32> to vector<1x128xf32>
    %18 = vector.broadcast %16 : vector<16x1xf32> to vector<16x128xf32>
    %19 = vector.broadcast %17 : vector<1x128xf32> to vector<16x128xf32>
    %20 = arith.subf %18, %19 : vector<16x128xf32>
    %21 = arith.mulf %20, %20 : vector<16x128xf32>
    %22 = arith.addf %15, %21 : vector<16x128xf32>
    %23 = vector.extract_strided_slice %7 {offsets = [0, 2], sizes = [16, 1], strides = [1, 1]} : vector<16x3xf32> to vector<16x1xf32>
    %24 = vector.extract_strided_slice %9 {offsets = [2, 0], sizes = [1, 128], strides = [1, 1]} : vector<3x128xf32> to vector<1x128xf32>
    %25 = vector.broadcast %23 : vector<16x1xf32> to vector<16x128xf32>
    %26 = vector.broadcast %24 : vector<1x128xf32> to vector<16x128xf32>
    %27 = arith.subf %25, %26 : vector<16x128xf32>
    %28 = arith.mulf %27, %27 : vector<16x128xf32>
    %29 = arith.addf %22, %28 : vector<16x128xf32>
    %30 = math.sqrt %29 : vector<16x128xf32>
    %31 = vector.broadcast %5 : f32 to vector<16x128xf32>
    %32 = arith.subf %31, %30 : vector<16x128xf32>
    %cst = arith.constant 0.000000e+00 : f32
    %33 = vector.broadcast %cst : f32 to vector<16x128xf32>
    %34 = arith.maximumf %32, %33 : vector<16x128xf32>
    %cst_9 = arith.constant dense<0.000000e+00> : vector<16xf32>
    %35 = vector.multi_reduction <add>, %34, %cst_9 [1] : vector<16x128xf32> to vector<16xf32>
    %36 = vector.shape_cast %35 : vector<16xf32> to vector<16x1xf32>
    %cst_10 = arith.constant dense<0.000000e+00> : vector<1xf32>
    %37 = vector.multi_reduction <add>, %36, %cst_10 [0] : vector<16x1xf32> to vector<1xf32>
    %38 = vector.shape_cast %37 : vector<1xf32> to vector<1x1xf32>
    %c0_11 = arith.constant 0 : index
    %c0_12 = arith.constant 0 : index
    %39 = vector.load %arg9[%c0_11, %c0_12] : memref<1x1xf32, #tpu.memory_space<vmem>>, vector<1x1xf32>
    %40 = arith.addf %39, %38 : vector<1x1xf32>
    %c0_13 = arith.constant 0 : index
    %c0_14 = arith.constant 0 : index
    %41 = vector.load %arg9[%c0_13, %c0_14] : memref<1x1xf32, #tpu.memory_space<vmem>>, vector<1x1xf32>
    tpu.vector_store %arg9[%c0_13, %c0_14], %40 {strides = array<i32>} : memref<1x1xf32, #tpu.memory_space<vmem>>, vector<1x1xf32>,
    %c0_i32_15 = arith.constant 0 : i32
    %42 = arith.cmpi eq, %arg1, %c0_i32_15 : i32
    %c0_i32_16 = arith.constant 0 : i32
    %43 = arith.cmpi eq, %arg2, %c0_i32_16 : i32
    %44 = arith.andi %42, %43 : i1
    %45 = arith.extui %44 : i1 to i32
    %c0_i32_17 = arith.constant 0 : i32
    %46 = arith.cmpi ne, %45, %c0_i32_17 : i32
    scf.if %46 {
      %c0_18 = arith.constant 0 : index
      %c0_19 = arith.constant 0 : index
      %47 = vector.load %arg9[%c0_18, %c0_19] : memref<1x1xf32, #tpu.memory_space<vmem>>, vector<1x1xf32>
      %48 = arith.index_cast %arg0 : i32 to index
      %49 = memref.load %arg5[%48] : memref<1xi32, #tpu.memory_space<smem>>
      %50 = arith.sitofp %49 : i32 to f32
      %cst_20 = arith.constant 0.000000e+00 : f32
      %51 = arith.maximumf %5, %cst_20 : f32
      %52 = arith.mulf %50, %51 : f32
      %53 = vector.broadcast %52 : f32 to vector<1x1xf32>
      %54 = arith.subf %47, %53 : vector<1x1xf32>
      %cst_21 = arith.constant 5.000000e-01 : f32
      %55 = vector.broadcast %cst_21 : f32 to vector<1x1xf32>
      %56 = arith.mulf %55, %54 : vector<1x1xf32>
      %c0_22 = arith.constant 0 : index
      %c0_23 = arith.constant 0 : index
      %57 = memref.load %arg4[%c0_22, %c0_23] : memref<1x1xi32, #tpu.memory_space<smem>>
      %c1_i32 = arith.constant 1 : i32
      %58 = arith.cmpi eq, %57, %c1_i32 : i32
      %59 = arith.select %58, %56, %47 : vector<1x1xf32>
      %60 = vector.shape_cast %59 : vector<1x1xf32> to vector<1x1x1xf32>
      %c0_24 = arith.constant 0 : index
      %c0_25 = arith.constant 0 : index
      %c0_26 = arith.constant 0 : index
      %61 = vector.load %arg8[%c0_24, %c0_25, %c0_26] : memref<1x1x1xf32, #tpu.memory_space<vmem>>, vector<1x1x1xf32>
      tpu.vector_store %arg8[%c0_24, %c0_25, %c0_26], %60 {strides = array<i32>} : memref<1x1x1xf32, #tpu.memory_space<vmem>>, vector<1x1x1xf32>,
    } else {
    }
    return
  }
  func.func @transform_0(%arg0: i32, %arg1: i32, %arg2: i32) -> (i32, i32) {
    %c0_i32 = arith.constant 0 : i32
    %c0_i32_0 = arith.constant 0 : i32
    %c0_i32_1 = arith.constant 0 : i32
    return %c0_i32, %c0_i32_0 : i32, i32
  }
  func.func @transform_1(%arg0: i32, %arg1: i32, %arg2: i32) -> (i32, i32) {
    %c0_i32 = arith.constant 0 : i32
    %c0_i32_0 = arith.constant 0 : i32
    %c0_i32_1 = arith.constant 0 : i32
    return %c0_i32, %c0_i32_0 : i32, i32
  }
  func.func @transform_2(%arg0: i32, %arg1: i32, %arg2: i32) -> i32 {
    %c0_i32 = arith.constant 0 : i32
    %c0_i32_0 = arith.constant 0 : i32
    return %c0_i32 : i32
  }
  func.func @transform_3(%arg0: i32, %arg1: i32, %arg2: i32) -> (i32, i32, i32) {
    %c0_i32 = arith.constant 0 : i32
    %c0_i32_0 = arith.constant 0 : i32
    return %arg0, %arg1, %c0_i32 : i32, i32, i32
  }
  func.func @transform_4(%arg0: i32, %arg1: i32, %arg2: i32) -> (i32, i32, i32) {
    %c0_i32 = arith.constant 0 : i32
    %c0_i32_0 = arith.constant 0 : i32
    return %arg0, %c0_i32, %arg2 : i32, i32, i32
  }
  func.func @transform_5(%arg0: i32, %arg1: i32, %arg2: i32) -> (i32, i32, i32) {
    %c0_i32 = arith.constant 0 : i32
    %c0_i32_0 = arith.constant 0 : i32
    %c0_i32_1 = arith.constant 0 : i32
    return %arg0, %c0_i32, %c0_i32_0 : i32, i32, i32
  }
}

</mosaic_0001>

<bundles_post_ra>
// kernel: tpu_custom_call.1
= control target key start
LH: loop header
LB: loop body
LE: loop exit
PB: predicated region body
PF: predicated region fallthrough
CT: control target
= control target key end

     0   :  { %v193_v1 = vmov 1   ;;  %v194_v2 = vmov 0   ;;  %s265_s0 = inlined_call_operand.<no memory space> [shape: f32[1,1], index: 0, kind: input, shape index: {}]   ;;  %s266_s1 = inlined_call_operand.<no memory space> [shape: s32[1,1], index: 1, kind: input, shape index: {}]   ;;  %s267_s2 = inlined_call_operand.<no memory space> [shape: s32[1], index: 2, kind: input, shape index: {}]   ;;  %s268_s3 = inlined_call_operand.vmem [shape: f32[1,16,3], index: 3, kind: input, shape index: {}]   ;;  %s269_s4 = inlined_call_operand.vmem [shape: f32[1,3,128], index: 4, kind: input, shape index: {}]   ;;  %s270_s5 = inlined_call_operand.hbm [shape: f32[1,1,1], index: 5, kind: output, shape index: {}]  }
   0x1   :  { %v33_v0 = vld [vmem:[%s268_s3] sm:$0xff]  ;;  %162 = vset.pattern.permute.xlu1 %v193_v1  ;;  %161 = vset.pattern.permute.xlu0 %v194_v2 }
   0x2   :  { %13 = vsyncpa [#allocation7], 0  ;;  %55 = vperm.xlu1 %162, %v33_v0   ;;  %38 = vperm.xlu0 %161, %v33_v0   ;;  %v34_v3 = vld [vmem:[%s268_s3 + $0x8] sm:$0xff]  ;;  %v195_v4 = vmov 2   ;;  %v46_v5 = vlaneseq  ;;  %v35_v9 = vld [vmem:[%s269_s4] sm:$0x7]  ;;  %v104_v40 = vstv %s265_s0  ;;  %s128_s26 = scvt.s32.f32 %s267_s2 }
   0x3   :  { %vm30_vm4 = vcmask 0   ;;  %v196_v51 = vmov 0.0   ;;  %s197_s27 = smov 0.0   ;;  %p135_p0 = scmp.eq.s32.totalorder %s266_s1, 1 }
   0x4   :  { %v47_v6 = vshrl.u32 %v46_v5, 7  ;;  %31 = vst.msk [vmem:[#allocation2] sm:$0x1] %vm30_vm4, %v196_v51  ;;  %s129_s30 = smax.f32 %s197_s27, %s265_s0  ;;  %s198_s10 = smov [#allocation6]  }
   0x5   :  { %s130_s8 = smul.f32 %s129_s30, %s128_s26  ;;  %s147_s2 = sshll.u32 %s198_s10, 4  ;;  %s148_s2 = int_to_ptr.vmem [resolvable:$true] %s147_s2 }
   0x6   :  { %59 = vperm.xlu1 %162, %v34_v3   ;;  %43 = vperm.xlu0 %161, %v34_v3   ;;  %v64_v7 = vsub.s32 1, %v47_v6  ;;  %v48_v8 = vsub.s32 0, %v47_v6  ;;  %v82_v14 = vsub.s32 2, %v47_v6  ;;  %s136_s9 = scalar_select %p135_p0, 1, 0 }
   0x7   :  { %v131_v63 = vstv %s130_s8  ;;  %s169_s0 = scalar_lea.vmem %s148_s2, 16  ;;  %s173_s11 = scalar_lea.vmem %s148_s2, 32 }
   0x8   :  { %v65_v10 = vrot.slane %v35_v9, %v64_v7  ;;  %v49_v12 = vrot.slane %v35_v9, %v48_v8  ;;  %v83_v21 = vrot.slane %v35_v9, %v82_v14  ;;  %p170_p1 = scmp.ne.s32.totalorder %s148_s2, %s169_s0  ;;  %p174_p2 = scmp.lt.s32.totalorder %s148_s2, %s148_s2 }
   0x9   :  { %p175_p3 = scmp.lt.s32.totalorder %s173_s11, %s169_s0 }
   0xa   :  { %164 = vset.pattern.permute.xlu1 %v195_v4  ;;  %163 = vset.pattern.permute.xlu0 %v195_v4 }
   0xb   :  { %77 = vperm.xlu1 %164, %v34_v3   ;;  %73 = vperm.xlu0 %163, %v33_v0   ;;  %v120_v60 = vld [vmem:[#allocation2] sm:$0x1]  ;;  %v137_v0 = vstv %s136_s9  ;;  %p176_p4 = por %p175_p3, %p174_p2 }
   0xc   :  { %vm138_vm5 = vcmp.eq.s32.totalorder %v137_v0, 1 }
   0xd   :  { %p177_p5 = pnand %p176_p4, %p170_p1 }
  0x81   :  { %v56_v11 = vpop.permute.xlu1 %55  ;;  %v39_v13 = vpop.permute.xlu0 %38 }
  0x82   :  { %v66_v15 = vsub.f32 %v56_v11, %v65_v10  ;;  %v50_v16 = vsub.f32 %v39_v13, %v49_v12 }
  0x84   :  { %v68_v22 = vmul.f32 %v66_v15, %v66_v15  ;;  %v52_v23 = vmul.f32 %v50_v16, %v50_v16 }
  0x85   :  { %v60_v17 = vpop.permute.xlu1 %59  ;;  %v44_v18 = vpop.permute.xlu0 %43 }
  0x86   :  { %v67_v19 = vsub.f32 %v60_v17, %v65_v10  ;;  %v51_v20 = vsub.f32 %v44_v18, %v49_v12  ;;  %v70_v30 = vadd.f32 %v68_v22, %v52_v23 }
  0x88   :  { %v69_v24 = vmul.f32 %v67_v19, %v67_v19  ;;  %v53_v25 = vmul.f32 %v51_v20, %v51_v20 }
  0x8a   :  { %v78_v26 = vpop.permute.xlu1 %77  ;;  %v74_v27 = vpop.permute.xlu0 %73  ;;  %v71_v31 = vadd.f32 %v69_v24, %v53_v25 }
  0x8b   :  { %v85_v28 = vsub.f32 %v78_v26, %v83_v21  ;;  %v84_v29 = vsub.f32 %v74_v27, %v83_v21 }
  0x8d   :  { %v87_v32 = vmul.f32 %v85_v28, %v85_v28  ;;  %v86_v33 = vmul.f32 %v84_v29, %v84_v29 }
  0x8f   :  { %v89_v34 = vadd.f32 %v87_v32, %v71_v31  ;;  %v88_v35 = vadd.f32 %v86_v33, %v70_v30 }
  0x91   :  { %165 = vrsqrt.f32 %v89_v34  ;;  %vm99_vm0 = vcmp.eq.f32.partialorder %v89_v34, inf  ;;  %v102_v39 = vand.u32 2147483648, %v89_v34  ;;  %vm101_vm1 = vcmp.eq.f32.partialorder %v89_v34, 0.0 }
  0x92   :  { %167 = vrsqrt.f32 %v88_v35  ;;  %vm92_vm2 = vcmp.eq.f32.partialorder %v88_v35, inf  ;;  %v95_v43 = vand.u32 2147483648, %v88_v35  ;;  %vm94_vm3 = vcmp.eq.f32.partialorder %v88_v35, 0.0 }
  0x9b   :  { %v166_v36 = vpop.eup %165 }
  0x9c   :  { %v168_v37 = vpop.eup %167  ;;  %v98_v38 = vmul.f32 %v166_v36, %v89_v34 }
  0x9d   :  { %v91_v41 = vmul.f32 %v168_v37, %v88_v35 }
  0x9e   :  { %v100_v42 = vsel %vm99_vm0, %v89_v34, %v98_v38 }
  0x9f   :  { %v103_v44 = vsel %vm101_vm1, %v102_v39, %v100_v42  ;;  %v93_v45 = vsel %vm92_vm2, %v88_v35, %v91_v41 }
  0xa0   :  { %v106_v46 = vsub.f32 %v104_v40, %v103_v44  ;;  %v96_v47 = vsel %vm94_vm3, %v95_v43, %v93_v45 }
  0xa1   :  { %v105_v48 = vsub.f32 %v104_v40, %v96_v47 }
  0xa2   :  { %v108_v49 = vmax.f32 %v106_v46, 0.0 }
  0xa3   :  { %v107_v50 = vmax.f32 %v105_v48, 0.0 }
  0xa4   :  { %111 = vadd.xlane.f32.xlu0 %v108_v49 }
  0xa5   :  { %109 = vadd.xlane.f32.xlu1 %v107_v50 }
 0x131   :  { %v112_v52 = vpop.xlane.xlu0 %111 }
 0x132   :  { %v110_v53 = vpop.xlane.xlu1 %109 }
 0x133   :  { %v113_v54 = vadd.f32 %v112_v52, %v110_v53 }
 0x135   :  { %v114_v55 = vrot.slane %v113_v54, 4 }
 0x137   :  { %v115_v56 = vadd.f32 %v114_v55, %v113_v54 }
 0x139   :  { %v116_v57 = vrot.slane %v115_v56, 2 }
 0x13b   :  { %v117_v58 = vadd.f32 %v116_v57, %v115_v56 }
 0x13d   :  { %v118_v59 = vrot.slane %v117_v58, 1 }
 0x13f   :  { %v119_v61 = vadd.f32 %v118_v59, %v117_v58 }
 0x141   :  { %v121_v62 = vadd.f32 %v120_v60, %v119_v61 }
 0x143   :  { %123 = vst.msk [vmem:[#allocation2] sm:$0x1] %vm30_vm4, %v121_v62 }
 0x14a   :  { %v126_v1 = vld [vmem:[#allocation2] sm:$0x1] }
 0x14b   :  { %v132_v2 = vsub.f32 %v126_v1, %v131_v63 }
 0x14d   :  { %v133_v3 = vmul.f32 0.5, %v132_v2 }
 0x14f   :  { %v139_v4 = vsel %vm138_vm5, %v133_v3, %v126_v1 }
 0x150   :  { %140 = vst.msk [vmem:[#allocation6] sm:$0x1] %vm30_vm4, %v139_v4 }
 0x151   :  { %180 = shalt.err (!%p177_p5)
}
 0x152   :  { %s181_s13 = scalar_lea.hbm %s270_s5, 16 }
 0x153   :  { %p182_p6 = scmp.ne.s32.totalorder %s270_s5, %s181_s13  ;;  %p185_p7 = scmp.lt.u32.totalorder %s181_s13, %s270_s5 }
 0x155   :  { %p187_p8 = pnand %p185_p7, %p182_p6 }
 0x157   :  { %190 = shalt.err (!%p187_p8)
}
 0x158   :  { %150 = dma.vmem_to_hbm [thread:$0]  %s148_s2, 16, %s270_s5, [#allocation7]  }
 0x159   :  { %191 = dma.done.wait [#allocation7], 16  }
 0x15a   :  { %192 = vsyncadd [#allocation7], 4294967280 }
 0x15b   :  { %154 = vsyncpa [#allocation7], 1 }

</bundles_post_ra>
